<compile_context>
chip_gen: v6e
topology: v6e:2x2x1
jax: 0.10.0
libtpu: 0.0.40
codegen_flags: <defaults>
</compile_context>

<pallas_src>
import math

import jax
import jax.numpy as jnp
from jax import lax
from jax.experimental import pallas as pl
from jax.experimental.pallas import tpu as pltpu

_MIB = 1024 * 1024


def _round_up(n, m):
    return (n + m - 1) // m * m


# --------------------------------------------------------------------------
# Device / VMEM planning
# --------------------------------------------------------------------------
def _device_plan():
    """Return (generation, vmem_limit_bytes, vmem_budget_bytes)."""
    kind = ""
    try:
        kind = jax.devices()[0].device_kind.lower()
    except Exception:
        pass
    if "v7" in kind or "7x" in kind:
        gen = "v7x"
    elif "v6" in kind:
        gen = "v6e"
    elif "v5" in kind:
        gen = "v5e"
    else:
        gen = "unknown"

    cap = None
    try:
        info = pltpu.get_tpu_info()
        cap = int(getattr(info, "vmem_capacity_bytes", 0)) or None
    except Exception:
        cap = None
    if cap is None:
        cap = {"v5e": 128 * _MIB, "v6e": 128 * _MIB, "v7x": 64 * _MIB}.get(
            gen, 64 * _MIB)

    limit = max(cap - 16 * _MIB, 32 * _MIB)     # scoped VMEM limit for Mosaic
    budget = max(limit - 8 * _MIB, 24 * _MIB)   # planner working-set budget
    return gen, limit, budget


def _resident_bytes(tm, C, d_ffn, xb, wb):
    """Working set when W1/W2 are fully VMEM-resident (tf == d_ffn)."""
    acts = 2 * 2 * tm * C * xb                  # x-in + out tiles, double-buffered
    wts = 2 * 2 * C * d_ffn * wb                # W1 + W2, double-buffered
    small = 2 * (3 * C + d_ffn) * 4             # gamma/beta/b1/b2 (f32)
    inter = tm * d_ffn * 4 + tm * C * 4         # f32 GELU + LN intermediates
    return acts + wts + small + inter


def _chunked_bytes(tm, tf, C, d_ffn, xb, wb):
    """Working set when d_ffn is chunked into tf-wide slices."""
    acts = 2 * 2 * tm * C * xb                  # x-in + out tiles, double-buffered
    wts = 2 * 2 * C * tf * wb                   # W1 + W2 slices, double-buffered
    small = 2 * (3 * C + d_ffn) * 4             # gamma/beta/b1/b2 (f32)
    scratch = tm * C * xb + tm * C * 4          # LN cache + f32 accumulator
    inter = tm * tf * 4                         # (tm, tf) f32 GELU intermediate
    return acts + wts + small + scratch + inter


def _plan_tiles(tokens, C, d_ffn, x_dtype, w_dtype, tm_req, tf_req, gen, budget):
    """Pick (token tile, d_ffn chunk) against the VMEM working-set budget."""
    xb = jnp.dtype(x_dtype).itemsize
    wb = jnp.dtype(w_dtype).itemsize
    pack = 16 if xb == 2 else 8
    tok_cap = _round_up(tokens, pack)

    # v7x: keep the token grid >= 2 blocks so both TensorCores get work.
    tm_cap = tok_cap
    if gen == "v7x" and tok_cap >= 256:
        tm_cap = max(128, (tok_cap // 2) // 128 * 128)

    def align(t):
        t = min(_round_up(t, pack), tm_cap)
        if t >= 128:
            t = (t // 128) * 128                # MXU-row aligned for big tiles
        return max(t, pack)

    if tm_req is not None and tf_req is not None:
        return align(tm_req), tf_req

    # ---- Phase 1: weights fully resident (tf = d_ffn) -- preferred regime:
    # W1/W2 are DMA'd from HBM exactly once for the whole kernel.
    if tf_req is None or tf_req == d_ffn:
        tm_cands = ([tm_req] if tm_req is not None
                    else [1024, 768, 512, 384, 256, 128])
        for t in tm_cands:
            tm = align(t)
            if _resident_bytes(tm, C, d_ffn, xb, wb) <= budget:
                return tm, d_ffn
        if tf_req == d_ffn:                     # forced resident: smallest tm
            return align(128), d_ffn

    # ---- Phase 2: chunk d_ffn; keep tm at/above the per-generation weight
    # re-stream crossover (shrink tf, never tm below the floor).
    tm_target = {"v5e": 256, "v6e": 1024, "v7x": 512}.get(gen, 512)
    tm_floor = {"v5e": 256, "v6e": 768, "v7x": 384}.get(gen, 256)
    if tm_req is not None:
        tm_target = tm_floor = tm_req
    if tf_req is not None:
        tf_cands = [tf_req]
    else:
        tf_cands = [t for t in (2048, 1024, 512, 256)
                    if t < d_ffn and d_ffn % t == 0]
        if not tf_cands:
            tf_cands = [128] if (d_ffn > 128 and d_ffn % 128 == 0) else [d_ffn]

    tm = align(tm_target)
    floor = align(tm_floor)
    while True:
        for tf in tf_cands:
            if _chunked_bytes(tm, tf, C, d_ffn, xb, wb) <= budget:
                return tm, tf
        if tm <= floor:
            break
        tm = max(floor, align(tm // 2))
    return floor, tf_cands[-1]


# --------------------------------------------------------------------------
# Kernels
# --------------------------------------------------------------------------
def _layer_norm32(xf, g, b):
    mean = jnp.mean(xf, axis=-1, keepdims=True)
    cen = xf - mean
    var = jnp.mean(cen * cen, axis=-1, keepdims=True)
    return cen * lax.rsqrt(var + 1e-5) * g + b


def _gelu_exact(h):
    return 0.5 * h * (1.0 + lax.erf(h * (1.0 / math.sqrt(2.0))))


def _ffn_kernel_resident(x_ref, g_ref, beta_ref, w1_ref, b1_ref, w2_ref, b2_ref,
                         o_ref):
    """Single-chunk path: weights fully resident, no accumulator scratch."""
    x = x_ref[...]                                       # (tm, C), input dtype
    xf = x.astype(jnp.float32)
    normed = _layer_norm32(xf, g_ref[...], beta_ref[...])
    h0 = normed.astype(x.dtype)                          # LayerNorm32 .type(x.dtype)
    # Conv1d(d_model -> d_ffn, k=1): (tm, C) @ (C, d_ffn), f32 accumulate.
    h1 = jnp.dot(h0, w1_ref[...], preferred_element_type=jnp.float32)
    h1 = _gelu_exact(h1 + b1_ref[...])
    # Conv1d(d_ffn -> d_model, k=1) + residual + bias, straight to output.
    h2 = jnp.dot(h1.astype(w2_ref.dtype), w2_ref[...],
                 preferred_element_type=jnp.float32)
    o_ref[...] = (xf + b2_ref[...] + h2).astype(o_ref.dtype)


def _ffn_kernel_chunked(x_ref, g_ref, beta_ref, w1_ref, b1_ref, w2_ref, b2_ref,
                        o_ref, h_ref, acc_ref):
    """Chunked path: grid = (token tiles, d_ffn chunks); axis 1 is a reduction."""
    j = pl.program_id(1)

    @pl.when(j == 0)
    def _init():
        x = x_ref[...]                                   # (tm, C), input dtype
        xf = x.astype(jnp.float32)
        normed = _layer_norm32(xf, g_ref[...], beta_ref[...])
        h_ref[...] = normed.astype(h_ref.dtype)          # cached once per tile
        acc_ref[...] = xf + b2_ref[...]                  # residual + bias folded

    # Conv1d(d_model -> d_ffn, k=1) chunk: (tm, C) @ (C, tf).
    h1 = jnp.dot(h_ref[...], w1_ref[...], preferred_element_type=jnp.float32)
    h1 = _gelu_exact(h1 + b1_ref[...])
    # Conv1d(d_ffn -> d_model, k=1) chunk, accumulate in f32.
    acc_ref[...] += jnp.dot(h1.astype(w2_ref.dtype), w2_ref[...],
                            preferred_element_type=jnp.float32)

    @pl.when(j == pl.num_programs(1) - 1)
    def _fin():
        o_ref[...] = acc_ref[...].astype(o_ref.dtype)


# --------------------------------------------------------------------------
# Wrappers
# --------------------------------------------------------------------------
def ffn_pallas_tokens(x_tok, gamma, beta, w1, b1, w2, b2, *, tm=None, tf=None):
    """Core entry point: x_tok is (tokens, d_model); returns (tokens, d_model)."""
    T, C = x_tok.shape
    d_ffn = w1.shape[1]
    assert w1.shape == (C, d_ffn) and w2.shape == (d_ffn, C)

    gen, vmem_limit, vmem_budget = _device_plan()
    tm, tf = _plan_tiles(T, C, d_ffn, x_tok.dtype, w1.dtype, tm, tf, gen,
                         vmem_budget)
    assert d_ffn % tf == 0, "d_ffn chunk must divide d_ffn"

    # Pad ragged token counts; zero rows are harmless (sliced off afterwards).
    T_pad = _round_up(T, tm)
    x_in = jnp.pad(x_tok, ((0, T_pad - T), (0, 0))) if T_pad != T else x_tok

    g2 = gamma.reshape(1, C).astype(jnp.float32)
    be2 = beta.reshape(1, C).astype(jnp.float32)
    b1_2 = b1.reshape(1, d_ffn).astype(jnp.float32)
    b2_2 = b2.reshape(1, C).astype(jnp.float32)

    xb = jnp.dtype(x_tok.dtype).itemsize
    wb = jnp.dtype(w1.dtype).itemsize
    n_tok_tiles = T_pad // tm
    weight_bytes = 2 * C * d_ffn * wb
    cost = pl.CostEstimate(
        flops=4 * T_pad * C * d_ffn,
        transcendentals=T_pad * d_ffn,
        bytes_accessed=int(2 * T_pad * C * xb
                           + weight_bytes * (1 if tf == d_ffn else n_tok_tiles)),
    )

    if tf == d_ffn:
        # Weight-resident path: 1-D token grid, no accumulator scratch.
        out = pl.pallas_call(
            _ffn_kernel_resident,
            out_shape=jax.ShapeDtypeStruct((T_pad, C), x_tok.dtype),
            grid=(n_tok_tiles,),
            in_specs=[
                pl.BlockSpec((tm, C), lambda i: (i, 0)),       # x tile
                pl.BlockSpec((1, C), lambda i: (0, 0)),        # gamma
                pl.BlockSpec((1, C), lambda i: (0, 0)),        # beta
                pl.BlockSpec((C, d_ffn), lambda i: (0, 0)),    # W1 (resident)
                pl.BlockSpec((1, d_ffn), lambda i: (0, 0)),    # b1
                pl.BlockSpec((d_ffn, C), lambda i: (0, 0)),    # W2 (resident)
                pl.BlockSpec((1, C), lambda i: (0, 0)),        # b2
            ],
            out_specs=pl.BlockSpec((tm, C), lambda i: (i, 0)),
            compiler_params=pltpu.CompilerParams(
                dimension_semantics=("parallel",),
                vmem_limit_bytes=vmem_limit,
            ),
            cost_estimate=cost,
        )(x_in, g2, be2, w1, b1_2, w2, b2_2)
    else:
        # Chunked path: d_ffn tiled on a reduction axis with an f32 accumulator.
        out = pl.pallas_call(
            _ffn_kernel_chunked,
            out_shape=jax.ShapeDtypeStruct((T_pad, C), x_tok.dtype),
            grid=(n_tok_tiles, d_ffn // tf),
            in_specs=[
                pl.BlockSpec((tm, C), lambda i, j: (i, 0)),    # x tile
                pl.BlockSpec((1, C), lambda i, j: (0, 0)),     # gamma
                pl.BlockSpec((1, C), lambda i, j: (0, 0)),     # beta
                pl.BlockSpec((C, tf), lambda i, j: (0, j)),    # W1 slice
                pl.BlockSpec((1, tf), lambda i, j: (0, j)),    # b1 slice
                pl.BlockSpec((tf, C), lambda i, j: (j, 0)),    # W2 slice
                pl.BlockSpec((1, C), lambda i, j: (0, 0)),     # b2
            ],
            out_specs=pl.BlockSpec((tm, C), lambda i, j: (i, 0)),
            scratch_shapes=[
                pltpu.VMEM((tm, C), x_tok.dtype),    # cached LayerNorm32 output
                pltpu.VMEM((tm, C), jnp.float32),    # f32 accumulator
            ],
            compiler_params=pltpu.CompilerParams(
                dimension_semantics=("parallel", "arbitrary"),
                vmem_limit_bytes=vmem_limit,
            ),
            cost_estimate=cost,
        )(x_in, g2, be2, w1, b1_2, w2, b2_2)

    return out[:T] if T_pad != T else out


def ffn_pallas_blc(x_blc, gamma, beta, w1, b1, w2, b2, **kw):
    """(B, L, d_model) entry point -- no HBM transposes (preferred)."""
    B, L, C = x_blc.shape
    out = ffn_pallas_tokens(x_blc.reshape(B * L, C), gamma, beta,
                            w1, b1, w2, b2, **kw)
    return out.reshape(B, L, C)


def ffn_pallas(x_ncl, gamma, beta, w1, b1, w2, b2, **kw):
    """Drop-in layout of the PyTorch module: x is (B, d_model, L)."""
    B, C, L = x_ncl.shape
    x_tok = jnp.transpose(x_ncl, (0, 2, 1)).reshape(B * L, C)
    out = ffn_pallas_tokens(x_tok, gamma, beta, w1, b1, w2, b2, **kw)
    return jnp.transpose(out.reshape(B, L, C), (0, 2, 1))


def ffn_reference(x_ncl, gamma, beta, w1, b1, w2, b2):
    """Pure-JAX reference of the PyTorch FFN forward (eval mode)."""
    xf = x_ncl.astype(jnp.float32)
    xt = jnp.transpose(xf, (0, 2, 1))                        # (B, L, C)
    mean = jnp.mean(xt, axis=-1, keepdims=True)
    var = jnp.mean((xt - mean) ** 2, axis=-1, keepdims=True)
    normed = (xt - mean) / jnp.sqrt(var + 1e-5) * gamma + beta
    normed = normed.astype(x_ncl.dtype).astype(jnp.float32)
    h1 = normed @ w1.astype(jnp.float32) + b1.astype(jnp.float32)
    h1 = 0.5 * h1 * (1.0 + lax.erf(h1 / jnp.sqrt(2.0)))
    h2 = h1 @ w2.astype(jnp.float32) + b2.astype(jnp.float32)
    out = h2 + xt
    return jnp.transpose(out, (0, 2, 1)).astype(x_ncl.dtype)


if __name__ == "__main__":
    key = jax.random.PRNGKey(0)
    kx1, kp1, kx2, kp2, kx3, kp3 = jax.random.split(key, 6)

    def make_params(k, d_model, dtype):
        d_ffn = 4 * d_model
        k1, k2, k3, k4 = jax.random.split(k, 4)
        gamma = jnp.ones((d_model,), jnp.float32)             # LayerNorm defaults
        beta = jnp.zeros((d_model,), jnp.float32)
        w1 = (jax.random.normal(k1, (d_model, d_ffn), jnp.float32) * 0.02).astype(dtype)
        b1 = (jax.random.normal(k2, (d_ffn,), jnp.float32) * 0.02).astype(dtype)
        w2 = (jax.random.normal(k3, (d_ffn, d_model), jnp.float32) * 0.02).astype(dtype)
        b2 = (jax.random.normal(k4, (d_model,), jnp.float32) * 0.02).astype(dtype)
        return gamma, beta, w1, b1, w2, b2

    def check(x, params, atol, rtol, **kw):
        out = jax.block_until_ready(ffn_pallas(x, *params, **kw))
        ref = ffn_reference(x, *params)
        assert out.shape == x.shape and out.dtype == x.dtype
        of, rf = out.astype(jnp.float32), ref.astype(jnp.float32)
        err = float(jnp.max(jnp.abs(of - rf)))
        assert jnp.allclose(of, rf, atol=atol, rtol=rtol), f"mismatch, max abs err {err}"

    # 1) small f32 case in the PyTorch (B, d_model, L) layout (resident path).
    x1 = jax.random.normal(kx1, (2, 32, 16), jnp.float32)
    check(x1, make_params(kp1, 32, jnp.float32), atol=1e-4, rtol=1e-4)

    # 2) f32 case exercising token padding (100 -> 128), a multi-tile token
    #    grid, and the d_ffn-chunked accumulator path (tf=128 over d_ffn=256).
    x2 = jax.random.normal(kx2, (2, 64, 50), jnp.float32)
    check(x2, make_params(kp2, 64, jnp.float32), atol=1e-3, rtol=1e-3, tm=32, tf=128)

    # 3) bf16 activations + bf16 weights with f32 MXU accumulation (resident).
    x3 = jax.random.normal(kx3, (2, 32, 24), jnp.float32).astype(jnp.bfloat16)
    check(x3, make_params(kp3, 32, jnp.bfloat16), atol=5e-2, rtol=5e-2)

    print("KERNEL_OK")
</pallas_src>

<mosaic_0001>
module attributes {stable_mosaic.version = 11 : i64} {
  func.func @_ffn_kernel_resident(%arg0: i32, %arg1: memref<32x32xf32, #tpu.memory_space<vmem>>, %arg2: memref<1x32xf32, #tpu.memory_space<vmem>>, %arg3: memref<1x32xf32, #tpu.memory_space<vmem>>, %arg4: memref<32x128xf32, #tpu.memory_space<vmem>>, %arg5: memref<1x128xf32, #tpu.memory_space<vmem>>, %arg6: memref<128x32xf32, #tpu.memory_space<vmem>>, %arg7: memref<1x32xf32, #tpu.memory_space<vmem>>, %arg8: memref<32x32xf32, #tpu.memory_space<vmem>>) attributes {dimension_semantics = [#tpu.dimension_semantics<parallel>], iteration_bounds = array<i64: 1>, scalar_prefetch = 0 : i64, scratch_operands = 0 : i64, tpu.core_type = #tpu.core_type<tc>, window_params = [{transform_indices = @transform_0, window_bounds = array<i64: 32, 32>}, {pipeline_mode = #tpu.pipeline_mode<synchronous>, transform_indices = @transform_1, window_bounds = array<i64: 1, 32>}, {pipeline_mode = #tpu.pipeline_mode<synchronous>, transform_indices = @transform_2, window_bounds = array<i64: 1, 32>}, {pipeline_mode = #tpu.pipeline_mode<synchronous>, transform_indices = @transform_3, window_bounds = array<i64: 32, 128>}, {pipeline_mode = #tpu.pipeline_mode<synchronous>, transform_indices = @transform_4, window_bounds = array<i64: 1, 128>}, {pipeline_mode = #tpu.pipeline_mode<synchronous>, transform_indices = @transform_5, window_bounds = array<i64: 128, 32>}, {pipeline_mode = #tpu.pipeline_mode<synchronous>, transform_indices = @transform_6, window_bounds = array<i64: 1, 32>}, {transform_indices = @transform_7, window_bounds = array<i64: 32, 32>}]} {
    %c0 = arith.constant 0 : index
    %c0_0 = arith.constant 0 : index
    %0 = vector.load %arg1[%c0, %c0_0] : memref<32x32xf32, #tpu.memory_space<vmem>>, vector<32x32xf32>
    %c0_1 = arith.constant 0 : index
    %c0_2 = arith.constant 0 : index
    %1 = vector.load %arg2[%c0_1, %c0_2] : memref<1x32xf32, #tpu.memory_space<vmem>>, vector<1x32xf32>
    %c0_3 = arith.constant 0 : index
    %c0_4 = arith.constant 0 : index
    %2 = vector.load %arg3[%c0_3, %c0_4] : memref<1x32xf32, #tpu.memory_space<vmem>>, vector<1x32xf32>
    %cst = arith.constant dense<0.000000e+00> : vector<32xf32>
    %3 = vector.multi_reduction <add>, %0, %cst [1] : vector<32x32xf32> to vector<32xf32>
    %4 = vector.shape_cast %3 : vector<32xf32> to vector<32x1xf32>
    %cst_5 = arith.constant 3.200000e+01 : f32
    %5 = vector.broadcast %cst_5 : f32 to vector<32x1xf32>
    %6 = arith.divf %4, %5 : vector<32x1xf32>
    %7 = vector.broadcast %6 : vector<32x1xf32> to vector<32x32xf32>
    %8 = arith.subf %0, %7 : vector<32x32xf32>
    %9 = arith.mulf %8, %8 : vector<32x32xf32>
    %cst_6 = arith.constant dense<0.000000e+00> : vector<32xf32>
    %10 = vector.multi_reduction <add>, %9, %cst_6 [1] : vector<32x32xf32> to vector<32xf32>
    %11 = vector.shape_cast %10 : vector<32xf32> to vector<32x1xf32>
    %cst_7 = arith.constant 3.200000e+01 : f32
    %12 = vector.broadcast %cst_7 : f32 to vector<32x1xf32>
    %13 = arith.divf %11, %12 : vector<32x1xf32>
    %cst_8 = arith.constant 9.99999974E-6 : f32
    %14 = vector.broadcast %cst_8 : f32 to vector<32x1xf32>
    %15 = arith.addf %13, %14 : vector<32x1xf32>
    %16 = math.rsqrt %15 : vector<32x1xf32>
    %17 = vector.broadcast %16 : vector<32x1xf32> to vector<32x32xf32>
    %18 = arith.mulf %8, %17 : vector<32x32xf32>
    %19 = vector.broadcast %1 : vector<1x32xf32> to vector<32x32xf32>
    %20 = arith.mulf %18, %19 : vector<32x32xf32>
    %21 = vector.broadcast %2 : vector<1x32xf32> to vector<32x32xf32>
    %22 = arith.addf %20, %21 : vector<32x32xf32>
    %c0_9 = arith.constant 0 : index
    %c0_10 = arith.constant 0 : index
    %23 = vector.load %arg4[%c0_9, %c0_10] : memref<32x128xf32, #tpu.memory_space<vmem>>, vector<32x128xf32>
    %cst_11 = arith.constant dense<0.000000e+00> : vector<32x128xf32>
    %24 = tpu.matmul %22, %23, %cst_11 {dimension_numbers = #tpu.dot_dimension_numbers<[1], [0], [0], [1], [0, 0, 1, 1], [], []>} : vector<32x32xf32>, vector<32x128xf32>, vector<32x128xf32> -> vector<32x128xf32>
    %c0_12 = arith.constant 0 : index
    %c0_13 = arith.constant 0 : index
    %25 = vector.load %arg5[%c0_12, %c0_13] : memref<1x128xf32, #tpu.memory_space<vmem>>, vector<1x128xf32>
    %26 = vector.broadcast %25 : vector<1x128xf32> to vector<32x128xf32>
    %27 = arith.addf %24, %26 : vector<32x128xf32>
    %cst_14 = arith.constant 5.000000e-01 : f32
    %28 = vector.broadcast %cst_14 : f32 to vector<32x128xf32>
    %29 = arith.mulf %28, %27 : vector<32x128xf32>
    %cst_15 = arith.constant 0.707106769 : f32
    %30 = vector.broadcast %cst_15 : f32 to vector<32x128xf32>
    %31 = arith.mulf %27, %30 : vector<32x128xf32>
    %32 = math.erf %31 : vector<32x128xf32>
    %cst_16 = arith.constant 1.000000e+00 : f32
    %33 = vector.broadcast %cst_16 : f32 to vector<32x128xf32>
    %34 = arith.addf %33, %32 : vector<32x128xf32>
    %35 = arith.mulf %29, %34 : vector<32x128xf32>
    %c0_17 = arith.constant 0 : index
    %c0_18 = arith.constant 0 : index
    %36 = vector.load %arg6[%c0_17, %c0_18] : memref<128x32xf32, #tpu.memory_space<vmem>>, vector<128x32xf32>
    %cst_19 = arith.constant dense<0.000000e+00> : vector<32x32xf32>
    %37 = tpu.matmul %35, %36, %cst_19 {dimension_numbers = #tpu.dot_dimension_numbers<[1], [0], [0], [1], [0, 0, 1, 1], [], []>} : vector<32x128xf32>, vector<128x32xf32>, vector<32x32xf32> -> vector<32x32xf32>
    %c0_20 = arith.constant 0 : index
    %c0_21 = arith.constant 0 : index
    %38 = vector.load %arg7[%c0_20, %c0_21] : memref<1x32xf32, #tpu.memory_space<vmem>>, vector<1x32xf32>
    %39 = vector.broadcast %38 : vector<1x32xf32> to vector<32x32xf32>
    %40 = arith.addf %0, %39 : vector<32x32xf32>
    %41 = arith.addf %40, %37 : vector<32x32xf32>
    %c0_22 = arith.constant 0 : index
    %c0_23 = arith.constant 0 : index
    %42 = vector.load %arg8[%c0_22, %c0_23] : memref<32x32xf32, #tpu.memory_space<vmem>>, vector<32x32xf32>
    tpu.vector_store %arg8[%c0_22, %c0_23], %41 {strides = array<i32>} : memref<32x32xf32, #tpu.memory_space<vmem>>, vector<32x32xf32>,
    return
  }
  func.func @transform_0(%arg0: i32) -> (i32, i32) {
    %c0_i32 = arith.constant 0 : i32
    %c0_i32_0 = arith.constant 0 : i32
    return %arg0, %c0_i32 : i32, i32
  }
  func.func @transform_1(%arg0: i32) -> (i32, i32) {
    %c0_i32 = arith.constant 0 : i32
    %c0_i32_0 = arith.constant 0 : i32
    %c0_i32_1 = arith.constant 0 : i32
    return %c0_i32, %c0_i32_0 : i32, i32
  }
  func.func @transform_2(%arg0: i32) -> (i32, i32) {
    %c0_i32 = arith.constant 0 : i32
    %c0_i32_0 = arith.constant 0 : i32
    %c0_i32_1 = arith.constant 0 : i32
    return %c0_i32, %c0_i32_0 : i32, i32
  }
  func.func @transform_3(%arg0: i32) -> (i32, i32) {
    %c0_i32 = arith.constant 0 : i32
    %c0_i32_0 = arith.constant 0 : i32
    %c0_i32_1 = arith.constant 0 : i32
    return %c0_i32, %c0_i32_0 : i32, i32
  }
  func.func @transform_4(%arg0: i32) -> (i32, i32) {
    %c0_i32 = arith.constant 0 : i32
    %c0_i32_0 = arith.constant 0 : i32
    %c0_i32_1 = arith.constant 0 : i32
    return %c0_i32, %c0_i32_0 : i32, i32
  }
  func.func @transform_5(%arg0: i32) -> (i32, i32) {
    %c0_i32 = arith.constant 0 : i32
    %c0_i32_0 = arith.constant 0 : i32
    %c0_i32_1 = arith.constant 0 : i32
    return %c0_i32, %c0_i32_0 : i32, i32
  }
  func.func @transform_6(%arg0: i32) -> (i32, i32) {
    %c0_i32 = arith.constant 0 : i32
    %c0_i32_0 = arith.constant 0 : i32
    %c0_i32_1 = arith.constant 0 : i32
    return %c0_i32, %c0_i32_0 : i32, i32
  }
  func.func @transform_7(%arg0: i32) -> (i32, i32) {
    %c0_i32 = arith.constant 0 : i32
    %c0_i32_0 = arith.constant 0 : i32
    return %arg0, %c0_i32 : i32, i32
  }
}

</mosaic_0001>

<bundles_post_ra>
// kernel: tpu_custom_call.1
= control target key start
LH: loop header
LB: loop body
LE: loop exit
PB: predicated region body
PF: predicated region fallthrough
CT: control target
= control target key end

     0   :  { %vm33_vm0 = vcmask 261120   ;;  %s676_s0 = inlined_call_operand.vmem [shape: f32[32,32], index: 0, kind: input, shape index: {}]   ;;  %s677_s1 = inlined_call_operand.vmem [shape: f32[1,32], index: 1, kind: input, shape index: {}]   ;;  %s678_s2 = inlined_call_operand.vmem [shape: f32[1,32], index: 2, kind: input, shape index: {}]   ;;  %s679_s3 = inlined_call_operand.vmem [shape: f32[32,128], index: 3, kind: input, shape index: {}]   ;;  %s680_s4 = inlined_call_operand.vmem [shape: f32[1,128], index: 4, kind: input, shape index: {}]   ;;  %s681_s5 = inlined_call_operand.vmem [shape: f32[128,32], index: 5, kind: input, shape index: {}]   ;;  %s682_s6 = inlined_call_operand.vmem [shape: f32[1,32], index: 6, kind: input, shape index: {}]   ;;  %s683_s7 = inlined_call_operand.hbm [shape: f32[32,32], index: 7, kind: output, shape index: {}]  }
   0x1   :  { %v546_v0 = vld [vmem:[%s676_s0] sm:$0xff]  ;;  %v551_v1 = vld [vmem:[%s676_s0 + $0x10] sm:$0xff]  ;;  %v556_v2 = vld [vmem:[%s676_s0 + $0x8] sm:$0xff] }
   0x2   :  { %v34_v3 = vsel %vm33_vm0, %v546_v0, 0.0  ;;  %v40_v4 = vsel %vm33_vm0, %v551_v1, 0.0  ;;  %v565_v5 = vld [vmem:[%s676_s0 + $0x18] sm:$0xff] }
   0x3   :  { %12 = vsyncpa [#allocation3], 0  ;;  %35 = vadd.xlane.f32.xlu0 %v34_v3  ;;  %41 = vadd.xlane.f32.xlu1 %v40_v4  ;;  %v37_v6 = vsel %vm33_vm0, %v556_v2, 0.0  ;;  %v43_v7 = vsel %vm33_vm0, %v565_v5, 0.0  ;;  %v110_v28 = vld [vmem:[%s679_s3 + $0x18] sm:$0xff]  ;;  %v109_v29 = vld [vmem:[%s679_s3 + $0x10] sm:$0xff] }
   0x4   :  { %407 = vmatprep.subr.mxu0 %v110_v28  ;;  %v108_v30 = vld [vmem:[%s679_s3 + $0x8] sm:$0xff]  ;;  %v107_v31 = vld [vmem:[%s679_s3] sm:$0xff]  ;;  %v250_v32 = vld [vmem:[%s681_s5 + $0x78] sm:$0xff] }
   0x5   :  { %408 = vmatpush3.msra.mxu0 %v110_v28  ;;  %v249_v33 = vld [vmem:[%s681_s5 + $0x70] sm:$0xff]  ;;  %421 = vmatprep.subr.mxu1 %v250_v32  ;;  %v248_v34 = vld [vmem:[%s681_s5 + $0x68] sm:$0xff]  ;;  %v371_v48 = vld [vmem:[%s677_s1] ss:$0 sm:$0xff] }
   0x6   :  { %409 = vmatprep.subr.mxu0 %v109_v29  ;;  %422 = vmatpush3.msra.mxu1 %v250_v32  ;;  %v372_v50 = vld [vmem:[%s678_s2] ss:$0 sm:$0xff]  ;;  %s500_s2 = smov [#allocation2]  }
   0x7   :  { %38 = vadd.xlane.f32.xlu0 %v37_v6  ;;  %44 = vadd.xlane.f32.xlu1 %v43_v7  ;;  %v247_v4 = vld [vmem:[%s681_s5 + $0x60] sm:$0xff]  ;;  %v246_v6 = vld [vmem:[%s681_s5 + $0x58] sm:$0xff]  ;;  %v245_v7 = vld [vmem:[%s681_s5 + $0x50] sm:$0xff]  ;;  %s360_s25 = sshll.u32 %s500_s2, 4  ;;  %s361_s25 = int_to_ptr.vmem [resolvable:$true] %s360_s25 }
   0x8   :  { %410 = vmatpush3.msra.mxu0 %v109_v29  ;;  %423 = vmatprep.subr.mxu1 %v249_v33  ;;  %p483_p1 = scmp.lt.s32.totalorder %s361_s25, %s361_s25 }
   0x9   :  { %411 = vmatprep.subr.mxu0 %v108_v30  ;;  %424 = vmatpush3.msra.mxu1 %v249_v33 }
   0xa   :  { %412 = vmatpush3.msra.mxu0 %v108_v30  ;;  %425 = vmatprep.subr.mxu1 %v248_v34 }
   0xb   :  { %413 = vmatprep.subr.mxu0 %v107_v31  ;;  %426 = vmatpush3.msra.mxu1 %v248_v34 }
   0xc   :  { %414 = vmatpush3.msra.mxu0 %v107_v31  ;;  %427 = vmatprep.subr.mxu1 %v247_v4 }
   0xd   :  { %428 = vmatpush3.msra.mxu1 %v247_v4 }
   0xe   :  { %429 = vmatprep.subr.mxu1 %v246_v6 }
   0xf   :  { %430 = vmatpush3.msra.mxu1 %v246_v6 }
  0x10   :  { %431 = vmatprep.subr.mxu1 %v245_v7 }
  0x11   :  { %432 = vmatpush3.msra.mxu1 %v245_v7 }
  0x8c   :  { %v36_v8 = vpop.xlane.xlu0 %35  ;;  %v42_v9 = vpop.xlane.xlu1 %41 }
  0x8d   :  { %v47_v10 = vmul.f32 0.03125, %v36_v8  ;;  %v49_v11 = vmul.f32 0.03125, %v42_v9  ;;  %v244_v8 = vld [vmem:[%s681_s5 + $0x48] sm:$0xff]  ;;  %v243_v9 = vld [vmem:[%s681_s5 + $0x40] sm:$0xff] }
  0x8e   :  { %433 = vmatprep.subr.mxu1 %v244_v8 }
  0x8f   :  { %v51_v12 = vsub.f32 %v546_v0, %v47_v10  ;;  %v573_v13 = vsub.f32 %v551_v1, %v49_v11  ;;  %434 = vmatpush3.msra.mxu1 %v244_v8  ;;  %v242_v10 = vld [vmem:[%s681_s5 + $0x38] sm:$0xff]  ;;  %v241_v11 = vld [vmem:[%s681_s5 + $0x30] sm:$0xff] }
  0x90   :  { %v39_v14 = vpop.xlane.xlu0 %38  ;;  %v45_v15 = vpop.xlane.xlu1 %44  ;;  %435 = vmatprep.subr.mxu1 %v243_v9 }
  0x91   :  { %v48_v16 = vmul.f32 0.03125, %v39_v14  ;;  %v50_v17 = vmul.f32 0.03125, %v45_v15  ;;  %v55_v18 = vmul.f32 %v51_v12, %v51_v12  ;;  %v57_v19 = vmul.f32 %v573_v13, %v573_v13  ;;  %436 = vmatpush3.msra.mxu1 %v243_v9  ;;  %v238_v14 = vld [vmem:[%s681_s5 + $0x18] sm:$0xff]  ;;  %v237_v15 = vld [vmem:[%s681_s5 + $0x10] sm:$0xff] }
  0x92   :  { %437 = vmatprep.subr.mxu1 %v242_v10 }
  0x93   :  { %v52_v20 = vsub.f32 %v556_v2, %v48_v16  ;;  %v579_v21 = vsub.f32 %v565_v5, %v50_v17  ;;  %v59_v22 = vsel %vm33_vm0, %v55_v18, 0.0  ;;  %v65_v23 = vsel %vm33_vm0, %v57_v19, 0.0  ;;  %438 = vmatpush3.msra.mxu1 %v242_v10  ;;  %v236_v16 = vld [vmem:[%s681_s5 + $0x8] sm:$0xff]  ;;  %v235_v17 = vld [vmem:[%s681_s5] sm:$0xff] }
  0x94   :  { %60 = vadd.xlane.f32.xlu0 %v59_v22  ;;  %439 = vmatprep.subr.mxu1 %v241_v11  ;;  %v373_v18 = vld [vmem:[%s680_s4] ss:$0 sm:$0xff] }
  0x95   :  { %v56_v24 = vmul.f32 %v52_v20, %v52_v20  ;;  %v58_v25 = vmul.f32 %v579_v21, %v579_v21  ;;  %440 = vmatpush3.msra.mxu1 %v241_v11 }
  0x97   :  { %v62_v26 = vsel %vm33_vm0, %v56_v24, 0.0  ;;  %v68_v27 = vsel %vm33_vm0, %v58_v25, 0.0 }
  0x98   :  { %66 = vadd.xlane.f32.xlu0 %v65_v23  ;;  %63 = vadd.xlane.f32.xlu1 %v62_v26 }
  0x9c   :  { %69 = vadd.xlane.f32.xlu1 %v68_v27 }
 0x11d   :  { %v61_v35 = vpop.xlane.xlu0 %60 }
 0x11e   :  { %v71_v36 = vmul.f32 0.03125, %v61_v35 }
 0x120   :  { %v75_v37 = vadd.f32 1e-05, %v71_v36 }
 0x121   :  { %v64_v38 = vpop.xlane.xlu1 %63  ;;  %v67_v39 = vpop.xlane.xlu0 %66 }
 0x122   :  { %462 = vrsqrt.f32 %v75_v37  ;;  %v72_v40 = vmul.f32 0.03125, %v64_v38  ;;  %v73_v41 = vmul.f32 0.03125, %v67_v39 }
 0x124   :  { %v76_v42 = vadd.f32 1e-05, %v72_v40  ;;  %v77_v43 = vadd.f32 1e-05, %v73_v41 }
 0x125   :  { %v70_v44 = vpop.xlane.xlu1 %69 }
 0x126   :  { %464 = vrsqrt.f32 %v76_v42  ;;  %v74_v45 = vmul.f32 0.03125, %v70_v44 }
 0x127   :  { %466 = vrsqrt.f32 %v77_v43 }
 0x128   :  { %v78_v46 = vadd.f32 1e-05, %v74_v45 }
 0x12a   :  { %468 = vrsqrt.f32 %v78_v46 }
 0x12f   :  { %v463_v47 = vpop.eup %462 }
 0x130   :  { %v83_v49 = vmul.f32 %v463_v47, %v51_v12  ;;  %v240_v12 = vld [vmem:[%s681_s5 + $0x28] sm:$0xff]  ;;  %v378_v47 = vld [vmem:[%s682_s6] ss:$0 sm:$0xff]  ;;  %s478_s6 = scalar_lea.vmem %s361_s25, 512 }
 0x131   :  { %441 = vmatprep.subr.mxu1 %v240_v12  ;;  %p479_p0 = scmp.ne.s32.totalorder %s361_s25, %s478_s6  ;;  %p484_p2 = scmp.lt.s32.totalorder %s478_s6, %s478_s6 }
 0x132   :  { %v93_v51 = vmul.f32 %v371_v48, %v83_v49  ;;  %442 = vmatpush3.msra.mxu1 %v240_v12  ;;  %v343_v49 = vadd.f32 %v378_v47, %v546_v0 }
 0x133   :  { %v465_v52 = vpop.eup %464  ;;  %p485_p3 = por %p484_p2, %p483_p1 }
 0x134   :  { %v467_v53 = vpop.eup %466  ;;  %v103_v54 = vadd.f32 %v372_v50, %v93_v51  ;;  %v84_v55 = vmul.f32 %v465_v52, %v52_v20  ;;  %v346_v52 = vadd.f32 %v378_v47, %v565_v5 }
 0x135   :  { %v85_v56 = vmul.f32 %v467_v53, %v573_v13  ;;  %v239_v13 = vld [vmem:[%s681_s5 + $0x20] sm:$0xff]  ;;  %p486_p4 = pnand %p485_p3, %p479_p0 }
 0x136   :  { %415 = vmatprep.mubr.msk.f32.mxu0 %vm33_vm0, %v103_v54  ;;  %v94_v57 = vmul.f32 %v371_v48, %v84_v55  ;;  %443 = vmatprep.subr.mxu1 %v239_v13  ;;  %v345_v55 = vadd.f32 %v378_v47, %v551_v1 }
 0x137   :  { %v469_v58 = vpop.eup %468  ;;  %v95_v59 = vmul.f32 %v371_v48, %v85_v56  ;;  %444 = vmatpush3.msra.mxu1 %v239_v13 }
 0x138   :  { %v104_v60 = vadd.f32 %v372_v50, %v94_v57  ;;  %v86_v61 = vmul.f32 %v469_v58, %v579_v21  ;;  %445 = vmatprep.subr.mxu1 %v238_v14 }
 0x139   :  { %v105_v62 = vadd.f32 %v372_v50, %v95_v59  ;;  %446 = vmatpush3.msra.mxu1 %v238_v14 }
 0x13a   :  { %416 = vmatmul.mubr.msk.f32.vlgmr.msra.gmra.mxu0 %vm33_vm0, %v104_v60  ;;  %v96_v63 = vmul.f32 %v371_v48, %v86_v61  ;;  %447 = vmatprep.subr.mxu1 %v237_v15  ;;  %v344_v48 = vadd.f32 %v378_v47, %v556_v2 }
 0x13b   :  { %418 = vmatprep.mubr.msk.f32.mxu0 %vm33_vm0, %v105_v62  ;;  %448 = vmatpush3.msra.mxu1 %v237_v15 }
 0x13c   :  { %v106_v3 = vadd.f32 %v372_v50, %v96_v63  ;;  %449 = vmatprep.subr.mxu1 %v236_v16 }
 0x13d   :  { %450 = vmatpush3.msra.mxu1 %v236_v16 }
 0x13e   :  { %419 = vmatmul.mubr.msk.f32.gmra.mxu0 %vm33_vm0, %v106_v3  ;;  %451 = vmatprep.subr.mxu1 %v235_v17 }
 0x13f   :  { %452 = vmatpush3.msra.mxu1 %v235_v17 }
 0x1fa   :  { %v417_v19 = vpop.f32.mrf.mxu0 }
 0x1fb   :  { %v202_v20 = vadd.f32 %v417_v19, %v373_v18 }
 0x1fc   :  { %v196_v21 = vpop.f32.mrf.mxu0 }
 0x1fd   :  { %v220_v22 = vmul.f32 0.70710677, %v202_v20  ;;  %v197_v23 = vadd.f32 %v373_v18, %v196_v21  ;;  %v216_v37 = vmul.f32 0.5, %v202_v20 }
 0x1fe   :  { %v420_v24 = vpop.f32.mrf.mxu0 }
 0x1ff   :  { %470 = verf.f32 %v220_v22  ;;  %v219_v25 = vmul.f32 0.70710677, %v197_v23  ;;  %v212_v26 = vadd.f32 %v420_v24, %v373_v18  ;;  %v215_v34 = vmul.f32 0.5, %v197_v23 }
 0x200   :  { %v206_v27 = vpop.f32.mrf.mxu0 }
 0x201   :  { %472 = verf.f32 %v219_v25  ;;  %v222_v28 = vmul.f32 0.70710677, %v212_v26  ;;  %v207_v29 = vadd.f32 %v373_v18, %v206_v27  ;;  %v218_v44 = vmul.f32 0.5, %v212_v26 }
 0x203   :  { %474 = verf.f32 %v222_v28  ;;  %v221_v30 = vmul.f32 0.70710677, %v207_v29  ;;  %v217_v42 = vmul.f32 0.5, %v207_v29 }
 0x205   :  { %476 = verf.f32 %v221_v30 }
 0x20c   :  { %v471_v31 = vpop.eup %470 }
 0x20d   :  { %v228_v33 = vadd.f32 1.0, %v471_v31 }
 0x20e   :  { %v473_v32 = vpop.eup %472 }
 0x20f   :  { %v227_v35 = vadd.f32 1.0, %v473_v32  ;;  %v232_v40 = vmul.f32 %v228_v33, %v216_v37 }
 0x210   :  { %v475_v36 = vpop.eup %474 }
 0x211   :  { %v231_v38 = vmul.f32 %v227_v35, %v215_v34  ;;  %v230_v41 = vadd.f32 1.0, %v475_v36 }
 0x212   :  { %v477_v39 = vpop.eup %476 }
 0x213   :  { %453 = vmatprep.mubr.f32.mxu1 %v231_v38  ;;  %v229_v43 = vadd.f32 1.0, %v477_v39  ;;  %v234_v46 = vmul.f32 %v230_v41, %v218_v44 }
 0x214   :  { %454 = vmatmul.mubr.f32.vlgmr.msra.gmra.mxu1 %v232_v40 }
 0x215   :  { %v233_v45 = vmul.f32 %v229_v43, %v217_v42 }
 0x217   :  { %456 = vmatprep.mubr.f32.mxu1 %v233_v45 }
 0x218   :  { %457 = vmatmul.mubr.f32.gmra.mxu1 %v234_v46 }
 0x2d4   :  { %v455_v50 = vpop.f32.mrf.mxu1 }
 0x2d5   :  { %v348_v51 = vadd.f32 %v455_v50, %v344_v48 }
 0x2d6   :  { %v317_v53 = vpop.f32.mrf.mxu1 }
 0x2d7   :  { %352 = vst.msk [vmem:[#allocation2 + $0x8] sm:$0xff] %vm33_vm0, %v348_v51  ;;  %v347_v54 = vadd.f32 %v343_v49, %v317_v53 }
 0x2d8   :  { %v458_v56 = vpop.f32.mrf.mxu1 }
 0x2d9   :  { %351 = vst.msk [vmem:[#allocation2] sm:$0xff] %vm33_vm0, %v347_v54  ;;  %v350_v57 = vadd.f32 %v458_v56, %v346_v52 }
 0x2da   :  { %v327_v58 = vpop.f32.mrf.mxu1 }
 0x2db   :  { %354 = vst.msk [vmem:[#allocation2 + $0x18] sm:$0xff] %vm33_vm0, %v350_v57  ;;  %v349_v0 = vadd.f32 %v345_v55, %v327_v58 }
 0x2dd   :  { %353 = vst.msk [vmem:[#allocation2 + $0x10] sm:$0xff] %vm33_vm0, %v349_v0 }
 0x2de   :  { %489 = shalt.err (!%p486_p4)
}
 0x2df   :  { %s501_s26 = smov 128   ;;  %s502_s27 = smov 8  }
 0x2e0   :  { %366 = dma.vmem_to_hbm [thread:$0]  %s361_s25, 512, %s683_s7, [#allocation3], %s501_s26, %s501_s26, %s502_s27  }
 0x2e1   :  { %498 = dma.done.wait [#allocation3], 512  }
 0x2e2   :  { %499 = vsyncadd [#allocation3], 4294966784 }
 0x2e3   :  { %370 = vsyncpa [#allocation3], 1 }

</bundles_post_ra>
